<compile_context>
chip_gen: v5e
topology: v5e:2x2
jax: 0.10.0
libtpu: 0.0.40
codegen_flags: <defaults>
</compile_context>

<pallas_src>
import jax
import jax.numpy as jnp
from jax import lax
from jax.experimental import pallas as pl
from jax.experimental.pallas import tpu as pltpu


def _cross_attention_kernel(q_ref, k_ref, v_ref,
                            wq_ref, bq_ref,
                            wk_ref, bk_ref,
                            wv_ref, bv_ref,
                            wf_ref, bf_ref,
                            g_ref,
                            o_ref):
    # Blocks: q/k/v/o are (Bt, S, H); weights are PyTorch layout (out, in) = (H, H);
    # biases / RMSNorm gain are (1, H).
    Bt, S, H = q_ref.shape

    q3 = q_ref[...].astype(jnp.float32)        # (Bt, S, H)
    k3 = k_ref[...].astype(jnp.float32)
    v3 = v_ref[...].astype(jnp.float32)

    # Flatten batch*seq so every Linear is ONE 2-D GEMM (leading-dim merge is layout-trivial).
    q2 = q3.reshape(Bt * S, H)
    k2 = k3.reshape(Bt * S, H)
    v2 = v3.reshape(Bt * S, H)

    # PyTorch Linear: x @ W.T + b with W stored (out, in).  Fold the transpose into the
    # contraction (last dim of x with last dim of W): no transpose is ever materialized.
    dn = (((1,), (1,)), ((), ()))

    def linear(x2d, w_ref, b_ref):
        y = lax.dot_general(x2d, w_ref[...], dimension_numbers=dn,
                            preferred_element_type=jnp.float32)
        return y + b_ref[...]

    scale = 1.0 / jnp.sqrt(jnp.float32(H))
    Q = (linear(q2, wq_ref, bq_ref) * scale).reshape(Bt, S, H)   # fold 1/sqrt(H) into Q
    K = linear(k2, wk_ref, bk_ref).reshape(Bt, S, H)
    V = linear(v2, wv_ref, bv_ref).reshape(Bt, S, H)

    # Batched Q @ K^T as a transposed contraction ('bqd,bkd->bqk'): MXU-fed directly, no K.T.
    scores = jnp.einsum('bqd,bkd->bqk', Q, K,
                        preferred_element_type=jnp.float32)      # (Bt, S, S)

    # Numerically-stable softmax with deferred normalization.
    m = jnp.max(scores, axis=-1, keepdims=True)
    e = jnp.exp(scores - m)
    denom = jnp.sum(e, axis=-1, keepdims=True)                   # (Bt, S, 1)

    # Dropout(0.5) on attention weights: eval-mode identity (see TODO above).

    ctx = jnp.einsum('bqk,bkd->bqd', e, V,
                     preferred_element_type=jnp.float32)         # (Bt, S, H)
    ctx = ctx * pl.reciprocal(denom, approx=True)                # EUP slot, not VALU

    out2 = linear(ctx.reshape(Bt * S, H), wf_ref, bf_ref)        # (Bt*S, H)

    # Residual (on the original q) + RMSNorm over the hidden dim, all in f32.
    res = out2 + q2
    ms = jnp.mean(res * res, axis=-1, keepdims=True)
    normed = g_ref[...] * (res * lax.rsqrt(ms + 1e-8))

    o_ref[...] = normed.reshape(Bt, S, H).astype(o_ref.dtype)


def cross_attention(q, k, v, params, *, block_b=None):
    """q, k, v: (B, S, H).  params: PyTorch-layout weights/biases (no pre-transposing needed)."""
    B, S, H = q.shape

    if block_b is None:
        # Largest divisor of B such that Bt*S stays around <=256 rows of MXU work per step.
        target = max(1, 256 // S)
        block_b = 1
        for d in range(1, B + 1):
            if B % d == 0 and d <= target:
                block_b = d
    Bt = block_b
    assert B % Bt == 0

    bq = params["w_q_b"].reshape(1, H)
    bk = params["w_k_b"].reshape(1, H)
    bv = params["w_v_b"].reshape(1, H)
    bf = params["fc_b"].reshape(1, H)
    g = params["norm_w"].reshape(1, H)

    qkv_spec = pl.BlockSpec((Bt, S, H), lambda b: (b, 0, 0))
    w_spec = pl.BlockSpec((H, H), lambda b: (0, 0))      # grid-invariant
    vec_spec = pl.BlockSpec((1, H), lambda b: (0, 0))    # grid-invariant

    # Advisory cost estimate: 4 Linear GEMMs + 2 attention matmuls; exp + rsqrt transcendentals.
    flops = B * (4 * 2 * S * H * H + 2 * 2 * S * S * H)
    transcendentals = B * S * S + B * S
    bytes_accessed = 4 * (4 * B * S * H + 4 * H * H + 5 * H)

    return pl.pallas_call(
        _cross_attention_kernel,
        out_shape=jax.ShapeDtypeStruct((B, S, H), q.dtype),
        grid_spec=pltpu.PrefetchScalarGridSpec(
            num_scalar_prefetch=0,
            grid=(B // Bt,),
            in_specs=[qkv_spec, qkv_spec, qkv_spec,
                      w_spec, vec_spec,
                      w_spec, vec_spec,
                      w_spec, vec_spec,
                      w_spec, vec_spec,
                      vec_spec],
            out_specs=pl.BlockSpec((Bt, S, H), lambda b: (b, 0, 0)),
        ),
        compiler_params=pltpu.CompilerParams(
            dimension_semantics=("parallel",)),
        cost_estimate=pl.CostEstimate(
            flops=flops,
            transcendentals=transcendentals,
            bytes_accessed=bytes_accessed),
    )(q, k, v,
      params["w_q_w"], bq,
      params["w_k_w"], bk,
      params["w_v_w"], bv,
      params["fc_w"], bf,
      g)


def _reference(q, k, v, params):
    """Pure-JAX reference of the PyTorch forward (eval mode)."""
    H = q.shape[-1]
    Q = q @ params["w_q_w"].T + params["w_q_b"]
    K = k @ params["w_k_w"].T + params["w_k_b"]
    V = v @ params["w_v_w"].T + params["w_v_b"]
    scores = (Q @ jnp.swapaxes(K, -2, -1)) / jnp.sqrt(jnp.float32(H))
    attn = jax.nn.softmax(scores, axis=-1)
    ctx = attn @ V
    out = ctx @ params["fc_w"].T + params["fc_b"]
    res = out + q
    rms = lax.rsqrt(jnp.mean(res ** 2, axis=-1, keepdims=True) + 1e-8)
    return params["norm_w"] * (res * rms)


if __name__ == "__main__":
    B, S, H = 2, 8, 32
    key = jax.random.PRNGKey(0)
    keys = jax.random.split(key, 12)

    q = jax.random.normal(keys[0], (B, S, H), dtype=jnp.float32)
    k = jax.random.normal(keys[1], (B, S, H), dtype=jnp.float32)
    v = jax.random.normal(keys[2], (B, S, H), dtype=jnp.float32)

    wscale = 1.0 / jnp.sqrt(jnp.float32(H))
    params = {
        "w_q_w": jax.random.normal(keys[3], (H, H), dtype=jnp.float32) * wscale,
        "w_q_b": jax.random.normal(keys[4], (H,), dtype=jnp.float32) * 0.1,
        "w_k_w": jax.random.normal(keys[5], (H, H), dtype=jnp.float32) * wscale,
        "w_k_b": jax.random.normal(keys[6], (H,), dtype=jnp.float32) * 0.1,
        "w_v_w": jax.random.normal(keys[7], (H, H), dtype=jnp.float32) * wscale,
        "w_v_b": jax.random.normal(keys[8], (H,), dtype=jnp.float32) * 0.1,
        "fc_w": jax.random.normal(keys[9], (H, H), dtype=jnp.float32) * wscale,
        "fc_b": jax.random.normal(keys[10], (H,), dtype=jnp.float32) * 0.1,
        "norm_w": jnp.ones((H,), dtype=jnp.float32),
    }

    out = cross_attention(q, k, v, params)
    out = jax.block_until_ready(out)

    ref = _reference(q, k, v, params)
    assert out.shape == (B, S, H)
    # Slightly relaxed tolerance: the only approximate op is the EUP reciprocal (approx=True)
    # used for the deferred softmax normalization; all reductions stay in f32.
    assert jnp.allclose(out, ref, atol=5e-3, rtol=5e-3), "mismatch vs reference"

    print("KERNEL_OK")
</pallas_src>

<mosaic_0001>
module attributes {stable_mosaic.version = 11 : i64} {
  func.func @_cross_attention_kernel(%arg0: i32, %arg1: memref<2x8x32xf32, #tpu.memory_space<vmem>>, %arg2: memref<2x8x32xf32, #tpu.memory_space<vmem>>, %arg3: memref<2x8x32xf32, #tpu.memory_space<vmem>>, %arg4: memref<32x32xf32, #tpu.memory_space<vmem>>, %arg5: memref<1x32xf32, #tpu.memory_space<vmem>>, %arg6: memref<32x32xf32, #tpu.memory_space<vmem>>, %arg7: memref<1x32xf32, #tpu.memory_space<vmem>>, %arg8: memref<32x32xf32, #tpu.memory_space<vmem>>, %arg9: memref<1x32xf32, #tpu.memory_space<vmem>>, %arg10: memref<32x32xf32, #tpu.memory_space<vmem>>, %arg11: memref<1x32xf32, #tpu.memory_space<vmem>>, %arg12: memref<1x32xf32, #tpu.memory_space<vmem>>, %arg13: memref<2x8x32xf32, #tpu.memory_space<vmem>>) attributes {dimension_semantics = [#tpu.dimension_semantics<parallel>], iteration_bounds = array<i64: 1>, scalar_prefetch = 0 : i64, scratch_operands = 0 : i64, tpu.core_type = #tpu.core_type<tc>, window_params = [{transform_indices = @transform_0, window_bounds = array<i64: 2, 8, 32>}, {transform_indices = @transform_1, window_bounds = array<i64: 2, 8, 32>}, {transform_indices = @transform_2, window_bounds = array<i64: 2, 8, 32>}, {pipeline_mode = #tpu.pipeline_mode<synchronous>, transform_indices = @transform_3, window_bounds = array<i64: 32, 32>}, {pipeline_mode = #tpu.pipeline_mode<synchronous>, transform_indices = @transform_4, window_bounds = array<i64: 1, 32>}, {pipeline_mode = #tpu.pipeline_mode<synchronous>, transform_indices = @transform_5, window_bounds = array<i64: 32, 32>}, {pipeline_mode = #tpu.pipeline_mode<synchronous>, transform_indices = @transform_6, window_bounds = array<i64: 1, 32>}, {pipeline_mode = #tpu.pipeline_mode<synchronous>, transform_indices = @transform_7, window_bounds = array<i64: 32, 32>}, {pipeline_mode = #tpu.pipeline_mode<synchronous>, transform_indices = @transform_8, window_bounds = array<i64: 1, 32>}, {pipeline_mode = #tpu.pipeline_mode<synchronous>, transform_indices = @transform_9, window_bounds = array<i64: 32, 32>}, {pipeline_mode = #tpu.pipeline_mode<synchronous>, transform_indices = @transform_10, window_bounds = array<i64: 1, 32>}, {pipeline_mode = #tpu.pipeline_mode<synchronous>, transform_indices = @transform_11, window_bounds = array<i64: 1, 32>}, {transform_indices = @transform_12, window_bounds = array<i64: 2, 8, 32>}]} {
    %c0 = arith.constant 0 : index
    %c0_0 = arith.constant 0 : index
    %c0_1 = arith.constant 0 : index
    %0 = vector.load %arg1[%c0, %c0_0, %c0_1] : memref<2x8x32xf32, #tpu.memory_space<vmem>>, vector<2x8x32xf32>
    %c0_2 = arith.constant 0 : index
    %c0_3 = arith.constant 0 : index
    %c0_4 = arith.constant 0 : index
    %1 = vector.load %arg2[%c0_2, %c0_3, %c0_4] : memref<2x8x32xf32, #tpu.memory_space<vmem>>, vector<2x8x32xf32>
    %c0_5 = arith.constant 0 : index
    %c0_6 = arith.constant 0 : index
    %c0_7 = arith.constant 0 : index
    %2 = vector.load %arg3[%c0_5, %c0_6, %c0_7] : memref<2x8x32xf32, #tpu.memory_space<vmem>>, vector<2x8x32xf32>
    %3 = vector.shape_cast %0 : vector<2x8x32xf32> to vector<16x32xf32>
    %4 = vector.shape_cast %1 : vector<2x8x32xf32> to vector<16x32xf32>
    %5 = vector.shape_cast %2 : vector<2x8x32xf32> to vector<16x32xf32>
    %cst = arith.constant 3.200000e+01 : f32
    %6 = math.sqrt %cst : f32
    %cst_8 = arith.constant 1.000000e+00 : f32
    %7 = arith.divf %cst_8, %6 : f32
    %c0_9 = arith.constant 0 : index
    %c0_10 = arith.constant 0 : index
    %8 = vector.load %arg4[%c0_9, %c0_10] : memref<32x32xf32, #tpu.memory_space<vmem>>, vector<32x32xf32>
    %cst_11 = arith.constant dense<0.000000e+00> : vector<16x32xf32>
    %9 = tpu.matmul %3, %8, %cst_11 {dimension_numbers = #tpu.dot_dimension_numbers<[1], [1], [0], [0], [0, 0, 1, 0], [], []>} : vector<16x32xf32>, vector<32x32xf32>, vector<16x32xf32> -> vector<16x32xf32>
    %c0_12 = arith.constant 0 : index
    %c0_13 = arith.constant 0 : index
    %10 = vector.load %arg5[%c0_12, %c0_13] : memref<1x32xf32, #tpu.memory_space<vmem>>, vector<1x32xf32>
    %11 = vector.broadcast %10 : vector<1x32xf32> to vector<16x32xf32>
    %12 = arith.addf %9, %11 : vector<16x32xf32>
    %13 = vector.broadcast %7 : f32 to vector<16x32xf32>
    %14 = arith.mulf %12, %13 : vector<16x32xf32>
    %15 = vector.shape_cast %14 : vector<16x32xf32> to vector<2x8x32xf32>
    %c0_14 = arith.constant 0 : index
    %c0_15 = arith.constant 0 : index
    %16 = vector.load %arg6[%c0_14, %c0_15] : memref<32x32xf32, #tpu.memory_space<vmem>>, vector<32x32xf32>
    %cst_16 = arith.constant dense<0.000000e+00> : vector<16x32xf32>
    %17 = tpu.matmul %4, %16, %cst_16 {dimension_numbers = #tpu.dot_dimension_numbers<[1], [1], [0], [0], [0, 0, 1, 0], [], []>} : vector<16x32xf32>, vector<32x32xf32>, vector<16x32xf32> -> vector<16x32xf32>
    %c0_17 = arith.constant 0 : index
    %c0_18 = arith.constant 0 : index
    %18 = vector.load %arg7[%c0_17, %c0_18] : memref<1x32xf32, #tpu.memory_space<vmem>>, vector<1x32xf32>
    %19 = vector.broadcast %18 : vector<1x32xf32> to vector<16x32xf32>
    %20 = arith.addf %17, %19 : vector<16x32xf32>
    %21 = vector.shape_cast %20 : vector<16x32xf32> to vector<2x8x32xf32>
    %c0_19 = arith.constant 0 : index
    %c0_20 = arith.constant 0 : index
    %22 = vector.load %arg8[%c0_19, %c0_20] : memref<32x32xf32, #tpu.memory_space<vmem>>, vector<32x32xf32>
    %cst_21 = arith.constant dense<0.000000e+00> : vector<16x32xf32>
    %23 = tpu.matmul %5, %22, %cst_21 {dimension_numbers = #tpu.dot_dimension_numbers<[1], [1], [0], [0], [0, 0, 1, 0], [], []>} : vector<16x32xf32>, vector<32x32xf32>, vector<16x32xf32> -> vector<16x32xf32>
    %c0_22 = arith.constant 0 : index
    %c0_23 = arith.constant 0 : index
    %24 = vector.load %arg9[%c0_22, %c0_23] : memref<1x32xf32, #tpu.memory_space<vmem>>, vector<1x32xf32>
    %25 = vector.broadcast %24 : vector<1x32xf32> to vector<16x32xf32>
    %26 = arith.addf %23, %25 : vector<16x32xf32>
    %27 = vector.shape_cast %26 : vector<16x32xf32> to vector<2x8x32xf32>
    "tpu.trace_start"() <{level = 10 : i32, message = "bqd,bkd->bqk"}> : () -> ()
    %cst_24 = arith.constant dense<0.000000e+00> : vector<2x8x8xf32>
    %28 = tpu.matmul %15, %21, %cst_24 {dimension_numbers = #tpu.dot_dimension_numbers<[2], [2], [1], [1], [0, 0, 0, 1, 1, 1], [0], [0]>} : vector<2x8x32xf32>, vector<2x8x32xf32>, vector<2x8x8xf32> -> vector<2x8x8xf32>
    "tpu.trace_stop"() : () -> ()
    %cst_25 = arith.constant dense<0xFF800000> : vector<2x8xf32>
    %29 = vector.multi_reduction <maximumf>, %28, %cst_25 [2] : vector<2x8x8xf32> to vector<2x8xf32>
    %30 = vector.shape_cast %29 : vector<2x8xf32> to vector<2x8x1xf32>
    %31 = vector.broadcast %30 : vector<2x8x1xf32> to vector<2x8x8xf32>
    %32 = arith.subf %28, %31 : vector<2x8x8xf32>
    %33 = math.exp %32 : vector<2x8x8xf32>
    %cst_26 = arith.constant dense<0.000000e+00> : vector<2x8xf32>
    %34 = vector.multi_reduction <add>, %33, %cst_26 [2] : vector<2x8x8xf32> to vector<2x8xf32>
    %35 = vector.shape_cast %34 : vector<2x8xf32> to vector<2x8x1xf32>
    "tpu.trace_start"() <{level = 10 : i32, message = "bqk,bkd->bqd"}> : () -> ()
    %cst_27 = arith.constant dense<0.000000e+00> : vector<2x8x32xf32>
    %36 = tpu.matmul %33, %27, %cst_27 {dimension_numbers = #tpu.dot_dimension_numbers<[2], [1], [1], [2], [0, 0, 0, 1, 1, 2], [0], [0]>} : vector<2x8x8xf32>, vector<2x8x32xf32>, vector<2x8x32xf32> -> vector<2x8x32xf32>
    "tpu.trace_stop"() : () -> ()
    %37 = tpu.reciprocal %35 {approx = true} : vector<2x8x1xf32> -> vector<2x8x1xf32>
    %38 = vector.broadcast %37 : vector<2x8x1xf32> to vector<2x8x32xf32>
    %39 = arith.mulf %36, %38 : vector<2x8x32xf32>
    %40 = vector.shape_cast %39 : vector<2x8x32xf32> to vector<16x32xf32>
    %c0_28 = arith.constant 0 : index
    %c0_29 = arith.constant 0 : index
    %41 = vector.load %arg10[%c0_28, %c0_29] : memref<32x32xf32, #tpu.memory_space<vmem>>, vector<32x32xf32>
    %cst_30 = arith.constant dense<0.000000e+00> : vector<16x32xf32>
    %42 = tpu.matmul %40, %41, %cst_30 {dimension_numbers = #tpu.dot_dimension_numbers<[1], [1], [0], [0], [0, 0, 1, 0], [], []>} : vector<16x32xf32>, vector<32x32xf32>, vector<16x32xf32> -> vector<16x32xf32>
    %c0_31 = arith.constant 0 : index
    %c0_32 = arith.constant 0 : index
    %43 = vector.load %arg11[%c0_31, %c0_32] : memref<1x32xf32, #tpu.memory_space<vmem>>, vector<1x32xf32>
    %44 = vector.broadcast %43 : vector<1x32xf32> to vector<16x32xf32>
    %45 = arith.addf %42, %44 : vector<16x32xf32>
    %46 = arith.addf %45, %3 : vector<16x32xf32>
    %47 = arith.mulf %46, %46 : vector<16x32xf32>
    %cst_33 = arith.constant dense<0.000000e+00> : vector<16xf32>
    %48 = vector.multi_reduction <add>, %47, %cst_33 [1] : vector<16x32xf32> to vector<16xf32>
    %49 = vector.shape_cast %48 : vector<16xf32> to vector<16x1xf32>
    %cst_34 = arith.constant 3.200000e+01 : f32
    %50 = vector.broadcast %cst_34 : f32 to vector<16x1xf32>
    %51 = arith.divf %49, %50 : vector<16x1xf32>
    %c0_35 = arith.constant 0 : index
    %c0_36 = arith.constant 0 : index
    %52 = vector.load %arg12[%c0_35, %c0_36] : memref<1x32xf32, #tpu.memory_space<vmem>>, vector<1x32xf32>
    %cst_37 = arith.constant 9.99999993E-9 : f32
    %53 = vector.broadcast %cst_37 : f32 to vector<16x1xf32>
    %54 = arith.addf %51, %53 : vector<16x1xf32>
    %55 = math.rsqrt %54 : vector<16x1xf32>
    %56 = vector.broadcast %55 : vector<16x1xf32> to vector<16x32xf32>
    %57 = arith.mulf %46, %56 : vector<16x32xf32>
    %58 = vector.broadcast %52 : vector<1x32xf32> to vector<16x32xf32>
    %59 = arith.mulf %58, %57 : vector<16x32xf32>
    %60 = vector.shape_cast %59 : vector<16x32xf32> to vector<2x8x32xf32>
    %c0_38 = arith.constant 0 : index
    %c0_39 = arith.constant 0 : index
    %c0_40 = arith.constant 0 : index
    %61 = vector.load %arg13[%c0_38, %c0_39, %c0_40] : memref<2x8x32xf32, #tpu.memory_space<vmem>>, vector<2x8x32xf32>
    tpu.vector_store %arg13[%c0_38, %c0_39, %c0_40], %60 {strides = array<i32>} : memref<2x8x32xf32, #tpu.memory_space<vmem>>, vector<2x8x32xf32>,
    return
  }
  func.func @transform_0(%arg0: i32) -> (i32, i32, i32) {
    %c0_i32 = arith.constant 0 : i32
    %c0_i32_0 = arith.constant 0 : i32
    %c0_i32_1 = arith.constant 0 : i32
    return %arg0, %c0_i32, %c0_i32_0 : i32, i32, i32
  }
  func.func @transform_1(%arg0: i32) -> (i32, i32, i32) {
    %c0_i32 = arith.constant 0 : i32
    %c0_i32_0 = arith.constant 0 : i32
    %c0_i32_1 = arith.constant 0 : i32
    return %arg0, %c0_i32, %c0_i32_0 : i32, i32, i32
  }
  func.func @transform_2(%arg0: i32) -> (i32, i32, i32) {
    %c0_i32 = arith.constant 0 : i32
    %c0_i32_0 = arith.constant 0 : i32
    %c0_i32_1 = arith.constant 0 : i32
    return %arg0, %c0_i32, %c0_i32_0 : i32, i32, i32
  }
  func.func @transform_3(%arg0: i32) -> (i32, i32) {
    %c0_i32 = arith.constant 0 : i32
    %c0_i32_0 = arith.constant 0 : i32
    %c0_i32_1 = arith.constant 0 : i32
    return %c0_i32, %c0_i32_0 : i32, i32
  }
  func.func @transform_4(%arg0: i32) -> (i32, i32) {
    %c0_i32 = arith.constant 0 : i32
    %c0_i32_0 = arith.constant 0 : i32
    %c0_i32_1 = arith.constant 0 : i32
    return %c0_i32, %c0_i32_0 : i32, i32
  }
  func.func @transform_5(%arg0: i32) -> (i32, i32) {
    %c0_i32 = arith.constant 0 : i32
    %c0_i32_0 = arith.constant 0 : i32
    %c0_i32_1 = arith.constant 0 : i32
    return %c0_i32, %c0_i32_0 : i32, i32
  }
  func.func @transform_6(%arg0: i32) -> (i32, i32) {
    %c0_i32 = arith.constant 0 : i32
    %c0_i32_0 = arith.constant 0 : i32
    %c0_i32_1 = arith.constant 0 : i32
    return %c0_i32, %c0_i32_0 : i32, i32
  }
  func.func @transform_7(%arg0: i32) -> (i32, i32) {
    %c0_i32 = arith.constant 0 : i32
    %c0_i32_0 = arith.constant 0 : i32
    %c0_i32_1 = arith.constant 0 : i32
    return %c0_i32, %c0_i32_0 : i32, i32
  }
  func.func @transform_8(%arg0: i32) -> (i32, i32) {
    %c0_i32 = arith.constant 0 : i32
    %c0_i32_0 = arith.constant 0 : i32
    %c0_i32_1 = arith.constant 0 : i32
    return %c0_i32, %c0_i32_0 : i32, i32
  }
  func.func @transform_9(%arg0: i32) -> (i32, i32) {
    %c0_i32 = arith.constant 0 : i32
    %c0_i32_0 = arith.constant 0 : i32
    %c0_i32_1 = arith.constant 0 : i32
    return %c0_i32, %c0_i32_0 : i32, i32
  }
  func.func @transform_10(%arg0: i32) -> (i32, i32) {
    %c0_i32 = arith.constant 0 : i32
    %c0_i32_0 = arith.constant 0 : i32
    %c0_i32_1 = arith.constant 0 : i32
    return %c0_i32, %c0_i32_0 : i32, i32
  }
  func.func @transform_11(%arg0: i32) -> (i32, i32) {
    %c0_i32 = arith.constant 0 : i32
    %c0_i32_0 = arith.constant 0 : i32
    %c0_i32_1 = arith.constant 0 : i32
    return %c0_i32, %c0_i32_0 : i32, i32
  }
  func.func @transform_12(%arg0: i32) -> (i32, i32, i32) {
    %c0_i32 = arith.constant 0 : i32
    %c0_i32_0 = arith.constant 0 : i32
    %c0_i32_1 = arith.constant 0 : i32
    return %arg0, %c0_i32, %c0_i32_0 : i32, i32, i32
  }
}

</mosaic_0001>

<bundles_post_ra>
// kernel: tpu_custom_call.1
= control target key start
LH: loop header
LB: loop body
LE: loop exit
PB: predicated region body
PF: predicated region fallthrough
CT: control target
= control target key end

     0   :  { %17 = vsyncpa [#allocation3], 0  ;;  %s1005_s0 = inlined_call_operand.hbm [shape: f32[2,8,32], index: 0, kind: input, shape index: {}]   ;;  %s1006_s1 = inlined_call_operand.hbm [shape: f32[2,8,32], index: 1, kind: input, shape index: {}]   ;;  %s1007_s2 = inlined_call_operand.hbm [shape: f32[2,8,32], index: 2, kind: input, shape index: {}]   ;;  %s1008_s3 = inlined_call_operand.hbm [shape: f32[32,32], index: 3, kind: input, shape index: {}]   ;;  %s1009_s4 = inlined_call_operand.vmem [shape: f32[1,32], index: 4, kind: input, shape index: {}]   ;;  %s1010_s5 = inlined_call_operand.hbm [shape: f32[32,32], index: 5, kind: input, shape index: {}]   ;;  %s1011_s6 = inlined_call_operand.vmem [shape: f32[1,32], index: 6, kind: input, shape index: {}]   ;;  %s1012_s7 = inlined_call_operand.hbm [shape: f32[32,32], index: 7, kind: input, shape index: {}]   ;;  %s1013_s8 = inlined_call_operand.vmem [shape: f32[1,32], index: 8, kind: input, shape index: {}]   ;;  %s1014_s9 = inlined_call_operand.hbm [shape: f32[32,32], index: 9, kind: input, shape index: {}]   ;;  %s1015_s10 = inlined_call_operand.vmem [shape: f32[1,32], index: 10, kind: input, shape index: {}]   ;;  %s1016_s11 = inlined_call_operand.vmem [shape: f32[1,32], index: 11, kind: input, shape index: {}]   ;;  %s1017_s12 = inlined_call_operand.hbm [shape: f32[2,8,32], index: 12, kind: output, shape index: {}]  }
   0x1   :  { %18 = vsyncpa [#allocation6], 0 }
   0x2   :  { %19 = vsyncpa [#allocation9], 0 }
   0x3   :  { %20 = vsyncpa [#allocation12], 0 }
   0x4   :  { %21 = vsyncpa [#allocation4], 0  ;;  %s39_s23 = sshll.u32 %s1006_s1, 4  ;;  %s816_s24 = smov [#allocation5]   ;;  %s40_s23 = int_to_ptr.hbm [resolvable:$true] %s39_s23 }
   0x5   :  { %s41_s25 = sshll.u32 %s816_s24, 4  ;;  %s65_s28 = sshll.u32 %s1008_s3, 4  ;;  %s42_s25 = int_to_ptr.vmem [resolvable:$true] %s41_s25  ;;  %s66_s28 = int_to_ptr.hbm [resolvable:$true] %s65_s28 }
   0x6   :  { %s817_s29 = smov 128   ;;  %s818_s30 = smov 8  }
   0x7   :  { %47 = dma.hbm_to_vmem [thread:$0]  %s40_s23, 256, %s42_s25, [#allocation6], %s817_s29, %s817_s29, %s818_s30  }
   0x8   :  { %s819_s13 = smov [#allocation8]   ;;  %s95_s1 = sshll.u32 %s1012_s7, 4  ;;  %s96_s1 = int_to_ptr.hbm [resolvable:$true] %s95_s1 }
   0x9   :  { %s67_s14 = sshll.u32 %s819_s13, 4  ;;  %s26_s18 = sshll.u32 %s1005_s0, 4  ;;  %s68_s14 = int_to_ptr.vmem [resolvable:$true] %s67_s14  ;;  %s27_s18 = int_to_ptr.hbm [resolvable:$true] %s26_s18 }
   0xa   :  { %73 = dma.hbm_to_vmem [thread:$0]  %s66_s28, 512, %s68_s14, [#allocation9], %s817_s29, %s817_s29, %s818_s30  }
   0xb   :  { %s820_s19 = smov [#allocation11]   ;;  %s821_s21 = smov [#allocation2]  }
   0xc   :  { %s97_s20 = sshll.u32 %s820_s19, 4  ;;  %s28_s7 = sshll.u32 %s821_s21, 4  ;;  %s98_s20 = int_to_ptr.vmem [resolvable:$true] %s97_s20  ;;  %s29_s7 = int_to_ptr.vmem [resolvable:$true] %s28_s7 }
   0xd   :  { %103 = dma.hbm_to_vmem [thread:$0]  %s96_s1, 512, %s98_s20, [#allocation12], %s817_s29, %s817_s29, %s818_s30  }
   0xe   :  { %s52_s24 = sshll.u32 %s1007_s2, 4  ;;  %s80_s26 = sshll.u32 %s1010_s5, 4  ;;  %s53_s24 = int_to_ptr.hbm [resolvable:$true] %s52_s24  ;;  %s81_s26 = int_to_ptr.hbm [resolvable:$true] %s80_s26 }
   0xf   :  { %34 = dma.hbm_to_vmem [thread:$0]  %s27_s18, 256, %s29_s7, [#allocation3], %s817_s29, %s817_s29, %s818_s30  }
  0x10   :  { %s822_s27 = smov [#allocation7]   ;;  %s823_s13 = smov [#allocation10]  }
  0x11   :  { %s54_s28 = sshll.u32 %s822_s27, 4  ;;  %s82_s2 = sshll.u32 %s823_s13, 4  ;;  %s55_s28 = int_to_ptr.vmem [resolvable:$true] %s54_s28  ;;  %s83_s2 = int_to_ptr.vmem [resolvable:$true] %s82_s2 }
  0x12   :  { %60 = dma.hbm_to_vmem [thread:$0]  %s53_s24, 256, %s55_s28, [#allocation6], %s817_s29, %s817_s29, %s818_s30  }
  0x13   :  { %s110_s16 = sshll.u32 %s1014_s9, 4  ;;  %s824_s5 = smov [#allocation13]   ;;  %s111_s16 = int_to_ptr.hbm [resolvable:$true] %s110_s16 }
  0x14   :  { %88 = dma.hbm_to_vmem [thread:$0]  %s81_s26, 512, %s83_s2, [#allocation9], %s817_s29, %s817_s29, %s818_s30  }
  0x15   :  { %s112_s1 = sshll.u32 %s824_s5, 4  ;;  %s113_s1 = int_to_ptr.vmem [resolvable:$true] %s112_s1 }
  0x16   :  { %118 = dma.hbm_to_vmem [thread:$0]  %s111_s16, 512, %s113_s1, [#allocation12], %s817_s29, %s817_s29, %s818_s30  }
  0x17   :  { %806 = dma.done.wait [#allocation3], 256  }
  0x18   :  { %807 = vsyncadd [#allocation3], 4294967040 }
  0x19   :  { %808 = dma.done.wait [#allocation6], 512  }
  0x1a   :  { %809 = vsyncadd [#allocation6], 4294966784 }
  0x1b   :  { %810 = dma.done.wait [#allocation9], 1024  }
  0x1c   :  { %811 = vsyncadd [#allocation9], 4294966272 }
  0x1d   :  { %812 = dma.done.wait [#allocation12], 1024  }
  0x1e   :  { %813 = vsyncadd [#allocation12], 4294966272  ;;  %vm165_vm0 = vcmask 261120   ;;  %v212_v0 = vld [vmem:[#allocation10 + $0x18] sm:$0xff]  ;;  %v211_v2 = vld [vmem:[#allocation10 + $0x10] sm:$0xff]  ;;  %vm359_vm1 = vcmask 64512  }
  0x1f   :  { %v160_v1 = vld [vmem:[#allocation8 + $0x18] sm:$0xff]  ;;  %556 = vmatpush.xpose.msk.msra.mxu1 %vm165_vm0, %v212_v0  ;;  %v159_v3 = vld [vmem:[#allocation8 + $0x10] sm:$0xff]  ;;  %v210_v4 = vld [vmem:[#allocation10 + $0x8] sm:$0xff]  ;;  %s826_s21 = smov [#allocation14]   ;;  %s534_s24 = sshll.u32 %s1017_s12, 4  ;;  %s535_s24 = int_to_ptr.hbm [resolvable:$true] %s534_s24 }
  0x20   :  { %550 = vmatpush.xpose.msk.msra.mxu0 %vm165_vm0, %v160_v1  ;;  %v158_v5 = vld [vmem:[#allocation8 + $0x8] sm:$0xff]  ;;  %v209_v6 = vld [vmem:[#allocation10] sm:$0xff]  ;;  %v942_v9 = vld [vmem:[#allocation2] sm:$0xff]  ;;  %s532_s7 = sshll.u32 %s826_s21, 4  ;;  %s533_s7 = int_to_ptr.vmem [resolvable:$true] %s532_s7 }
  0x21   :  { %v157_v7 = vld [vmem:[#allocation8] sm:$0xff]  ;;  %v154_v10 = vld [vmem:[#allocation5 + $0x8] sm:$0xff]  ;;  %v947_v11 = vld [vmem:[#allocation2 + $0x8] sm:$0xff] }
  0x22   :  { %v153_v8 = vld [vmem:[#allocation5] sm:$0xff]  ;;  %v261_v12 = vld [vmem:[#allocation11 + $0x18] sm:$0xff]  ;;  %v260_v13 = vld [vmem:[#allocation11 + $0x10] sm:$0xff] }
  0x23   :  { %557 = vmatpush.xpose.msk.msra.mxu1 %vm165_vm0, %v211_v2  ;;  %562 = vmatpush.xpose.msk.msra.mxu2 %vm165_vm0, %v261_v12  ;;  %v259_v14 = vld [vmem:[#allocation11 + $0x8] sm:$0xff]  ;;  %v258_v15 = vld [vmem:[#allocation11] sm:$0xff]  ;;  %v155_v16 = vld [vmem:[#allocation7] sm:$0xff] }
  0x24   :  { %551 = vmatpush.xpose.msk.msra.mxu0 %vm165_vm0, %v159_v3  ;;  %v595_v17 = vld [vmem:[%s1011_s6] ss:$0 sm:$0xff]  ;;  %v156_v24 = vld [vmem:[#allocation7 + $0x8] sm:$0xff]  ;;  %v429_v51 = vld [vmem:[#allocation13 + $0x8] sm:$0xff] }
  0x25   :  { %v596_v18 = vld [vmem:[%s1009_s4] ss:$0 sm:$0xff]  ;;  %v431_v49 = vld [vmem:[#allocation13 + $0x18] sm:$0xff]  ;;  %v428_v52 = vld [vmem:[#allocation13] sm:$0xff] }
  0x26   :  { %v597_v34 = vld [vmem:[%s1013_s8] ss:$0 sm:$0xff] }
  0x27   :  { %558 = vmatpush.xpose.msk.msra.mxu1 %vm165_vm0, %v210_v4  ;;  %563 = vmatpush.xpose.msk.msra.mxu2 %vm165_vm0, %v260_v13  ;;  %v430_v50 = vld [vmem:[#allocation13 + $0x10] sm:$0xff] }
  0x28   :  { %552 = vmatpush.xpose.msk.msra.mxu0 %vm165_vm0, %v158_v5  ;;  %v598_v61 = vld [vmem:[%s1015_s10] ss:$0 sm:$0xff] }
  0x2b   :  { %559 = vmatpush.xpose.msk.msra.mxu1 %vm165_vm0, %v209_v6  ;;  %564 = vmatpush.xpose.msk.msra.mxu2 %vm165_vm0, %v259_v14 }
  0x2c   :  { %553 = vmatpush.xpose.msk.msra.mxu0 %vm165_vm0, %v157_v7 }
  0x2e   :  { %560 = vmatmul.msk.f32.vlgmr.msra.gmra.mxu1 %vm165_vm0, %v153_v8  ;;  %v825_v8 = vmov 32.0  }
  0x2f   :  { %554 = vmatmul.msk.f32.vlgmr.msra.gmra.mxu0 %vm165_vm0, %v942_v9  ;;  %565 = vmatpush.xpose.msk.msra.mxu2 %vm165_vm0, %v258_v15 }
  0x30   :  { %574 = vmatpush.xpose.msk.msrb.mxu0 %vm165_vm0, %v431_v49  ;;  %580 = vmatpush.xpose.msk.msrb.mxu1 %vm165_vm0, %v431_v49 }
  0x32   :  { %566 = vmatmul.msk.f32.vlgmr.msra.gmra.mxu2 %vm165_vm0, %v155_v16 }
  0x34   :  { %575 = vmatpush.xpose.msk.msrb.mxu0 %vm165_vm0, %v430_v50  ;;  %581 = vmatpush.xpose.msk.msrb.mxu1 %vm165_vm0, %v430_v50 }
  0x36   :  { %561 = vmatmul.msk.f32.gmra.mxu1 %vm165_vm0, %v154_v10 }
  0x37   :  { %555 = vmatmul.msk.f32.gmra.mxu0 %vm165_vm0, %v947_v11 }
  0x38   :  { %576 = vmatpush.xpose.msk.msrb.mxu0 %vm165_vm0, %v429_v51  ;;  %582 = vmatpush.xpose.msk.msrb.mxu1 %vm165_vm0, %v429_v51 }
  0x3a   :  { %567 = vmatmul.msk.f32.gmra.mxu2 %vm165_vm0, %v156_v24 }
  0x3c   :  { %577 = vmatpush.xpose.msk.msrb.mxu0 %vm165_vm0, %v428_v52  ;;  %583 = vmatpush.xpose.msk.msrb.mxu1 %vm165_vm0, %v428_v52 }
  0xab   :  { %v252_v19 = vpop.f32.mrf.mxu1 }
  0xac   :  { %v201_v20 = vpop.f32.mrf.mxu0  ;;  %v253_v21 = vadd.f32 %v595_v17, %v252_v19 }
  0xad   :  { %v202_v22 = vadd.f32 %v596_v18, %v201_v20 }
  0xae   :  { %568 = vmatpush.xpose.msk.msra.mxu3 %vm165_vm0, %v253_v21 }
  0xaf   :  { %v207_v23 = vmul.f32 0.17677669, %v202_v22 }
  0xb1   :  { %569 = vmatmul.msk.f32.vlgmr.msra.gmra.mxu3 %vm165_vm0, %v207_v23 }
  0xb3   :  { %v255_v25 = vpop.f32.mrf.mxu1 }
  0xb4   :  { %v204_v26 = vpop.f32.mrf.mxu0  ;;  %v256_v27 = vadd.f32 %v595_v17, %v255_v25 }
  0xb5   :  { %v205_v28 = vadd.f32 %v596_v18, %v204_v26  ;;  %v301_v35 = vpop.f32.mrf.mxu2 }
  0xb6   :  { %570 = vmatpush.xpose.msk.msrb.mxu3 %vm165_vm0, %v256_v27  ;;  %v302_v36 = vadd.f32 %v597_v34, %v301_v35 }
  0xb7   :  { %v208_v29 = vmul.f32 0.17677669, %v205_v28 }
  0xb9   :  { %571 = vmatmul.msk.f32.vlgmr.msrb.gmra.mxu3 %vm165_vm0, %v208_v29  ;;  %v599_v29 = vld [vmem:[%s1016_s11] ss:$0 sm:$0xff] }
  0xba   :  { %396 = vmatpush.msra.mxu3 %v302_v36 }
  0xbd   :  { %v304_v37 = vpop.f32.mrf.mxu2 }
  0xbe   :  { %v305_v38 = vadd.f32 %v597_v34, %v304_v37 }
  0xc0   :  { %419 = vmatpush.msrb.mxu3 %v305_v38 }
 0x134   :  { %v330_v30 = vpop.f32.mrf.mxu3 }
 0x135   :  { %v360_v31 = vsel %vm359_vm1, %v330_v30, -inf }
 0x136   :  { %361 = vmax.xlane.f32.xlu0 %v360_v31 }
 0x13c   :  { %v356_v32 = vpop.f32.mrf.mxu3 }
 0x13d   :  { %v363_v33 = vsel %vm359_vm1, %v356_v32, -inf }
 0x13e   :  { %364 = vmax.xlane.f32.xlu0 %v363_v33 }
 0x1a9   :  { %v362_v39 = vpop.xlane.xlu0 %361 }
 0x1aa   :  { %v366_v40 = vsub.f32 %v330_v30, %v362_v39 }
 0x1ac   :  { %v368_v41 = vmul.f32 1.442695, %v366_v40 }
 0x1ae   :  { %600 = vpow2.f32 %v368_v41 }
 0x1b1   :  { %v365_v42 = vpop.xlane.xlu0 %364 }
 0x1b2   :  { %v367_v43 = vsub.f32 %v356_v32, %v365_v42 }
 0x1b4   :  { %v601_v44 = vpop.eup %600  ;;  %v370_v45 = vmul.f32 1.442695, %v367_v43 }
 0x1b5   :  { %572 = vmatmul.msk.f32.vlgmr.msra.gmra.mxu3 %vm359_vm1, %v601_v44  ;;  %v372_v46 = vsel %vm359_vm1, %v601_v44, 0.0 }
 0x1b6   :  { %602 = vpow2.f32 %v370_v45  ;;  %373 = vadd.xlane.f32.xlu1 %v372_v46 }
 0x1bc   :  { %v603_v47 = vpop.eup %602 }
 0x1bd   :  { %573 = vmatmul.msk.f32.vlgmr.msrb.gmra.mxu3 %vm359_vm1, %v603_v47  ;;  %v375_v48 = vsel %vm359_vm1, %v603_v47, 0.0 }
 0x1be   :  { %376 = vadd.xlane.f32.xlu1 %v375_v48 }
 0x229   :  { %v374_v53 = vpop.xlane.xlu1 %373 }
 0x22a   :  { %604 = vrcp.f32 %v374_v53 }
 0x230   :  { %v605_v55 = vpop.eup %604 }
 0x231   :  { %v377_v54 = vpop.xlane.xlu1 %376 }
 0x232   :  { %606 = vrcp.f32 %v377_v54 }
 0x233   :  { %608 = vrcp.f32 %v825_v8 }
 0x238   :  { %v398_v56 = vpop.f32.mrf.mxu3  ;;  %v607_v58 = vpop.eup %606 }
 0x239   :  { %v426_v57 = vmul.f32 %v605_v55, %v398_v56  ;;  %v609_v10 = vpop.eup %608 }
 0x23a   :  { %v488_v12 = vmul.f32 32.0, %v609_v10  ;;  %vm492_vm2 = vweird.f32 %v609_v10 }
 0x23b   :  { %578 = vmatmul.msk.f32.vlgmr.msrb.gmra.mxu0 %vm165_vm0, %v426_v57 }
 0x23c   :  { %v489_v13 = vsub.f32 1.0, %v488_v12 }
 0x23e   :  { %v490_v14 = vmul.f32 %v609_v10, %v489_v13 }
 0x240   :  { %v421_v59 = vpop.f32.mrf.mxu3  ;;  %v491_v15 = vadd.f32 %v609_v10, %v490_v14 }
 0x241   :  { %v427_v60 = vmul.f32 %v607_v58, %v421_v59 }
 0x243   :  { %579 = vmatmul.msk.f32.vlgmr.msrb.gmra.mxu1 %vm165_vm0, %v427_v60 }
 0x2b8   :  { %v471_v62 = vpop.f32.mrf.mxu0 }
 0x2b9   :  { %v472_v63 = vadd.f32 %v598_v61, %v471_v62 }
 0x2bb   :  { %v477_v0 = vadd.f32 %v472_v63, %v942_v9  ;;  %v493_v9 = vsel %vm492_vm2, %v609_v10, %v491_v15 }
 0x2bd   :  { %v479_v1 = vmul.f32 %v477_v0, %v477_v0 }
 0x2bf   :  { %v481_v2 = vsel %vm165_vm0, %v479_v1, 0.0 }
 0x2c0   :  { %482 = vadd.xlane.f32.xlu2 %v481_v2  ;;  %v474_v3 = vpop.f32.mrf.mxu1 }
 0x2c1   :  { %v475_v4 = vadd.f32 %v598_v61, %v474_v3 }
 0x2c3   :  { %v478_v5 = vadd.f32 %v475_v4, %v947_v11 }
 0x2c5   :  { %v480_v6 = vmul.f32 %v478_v5, %v478_v5 }
 0x2c7   :  { %v484_v7 = vsel %vm165_vm0, %v480_v6, 0.0 }
 0x2c8   :  { %485 = vadd.xlane.f32.xlu2 %v484_v7 }
 0x333   :  { %v483_v16 = vpop.xlane.xlu2 %482 }
 0x334   :  { %v494_v17 = vmul.f32 %v493_v9, %v483_v16 }
 0x336   :  { %v497_v18 = vadd.f32 1e-08, %v494_v17 }
 0x338   :  { %610 = vrsqrt.f32 %v497_v18  ;;  %vm505_vm4 = vweird.f32 %v497_v18 }
 0x33b   :  { %v486_v19 = vpop.xlane.xlu2 %485 }
 0x33c   :  { %v495_v20 = vmul.f32 %v493_v9, %v486_v19 }
 0x33e   :  { %v611_v11 = vpop.eup %610  ;;  %v498_v21 = vadd.f32 1e-08, %v495_v20 }
 0x33f   :  { %v500_v22 = vmul.f32 %v611_v11, %v497_v18  ;;  %vm506_vm3 = vweird.f32 %v611_v11 }
 0x340   :  { %612 = vrsqrt.f32 %v498_v21  ;;  %vm507_vm5 = vmor %vm505_vm4, %vm506_vm3  ;;  %vm515_vm7 = vweird.f32 %v498_v21 }
 0x341   :  { %v501_v23 = vmul.f32 %v611_v11, %v500_v22 }
 0x343   :  { %v502_v24 = vmul.f32 0.5, %v501_v23 }
 0x345   :  { %v503_v25 = vsub.f32 1.5, %v502_v24 }
 0x346   :  { %v613_v26 = vpop.eup %612 }
 0x347   :  { %v504_v27 = vmul.f32 %v611_v11, %v503_v25  ;;  %v510_v28 = vmul.f32 %v613_v26, %v498_v21  ;;  %vm516_vm6 = vweird.f32 %v613_v26 }
 0x348   :  { %vm517_vm8 = vmor %vm515_vm7, %vm516_vm6 }
 0x349   :  { %v508_v30 = vsel %vm507_vm5, %v611_v11, %v504_v27  ;;  %v511_v31 = vmul.f32 %v613_v26, %v510_v28 }
 0x34a   :  { %v519_v32 = vmul.f32 %v508_v30, %v477_v0 }
 0x34b   :  { %v512_v33 = vmul.f32 0.5, %v511_v31 }
 0x34c   :  { %v524_v34 = vmul.f32 %v599_v29, %v519_v32 }
 0x34d   :  { %v513_v35 = vsub.f32 1.5, %v512_v33 }
 0x34e   :  { %526 = vst.msk [vmem:[#allocation14] sm:$0xff] %vm165_vm0, %v524_v34 }
 0x34f   :  { %v514_v36 = vmul.f32 %v613_v26, %v513_v35 }
 0x351   :  { %v518_v37 = vsel %vm517_vm8, %v613_v26, %v514_v36 }
 0x352   :  { %v520_v38 = vmul.f32 %v518_v37, %v478_v5 }
 0x354   :  { %v525_v39 = vmul.f32 %v599_v29, %v520_v38 }
 0x356   :  { %527 = vst.msk [vmem:[#allocation14 + $0x8] sm:$0xff] %vm165_vm0, %v525_v39 }
 0x357   :  { %540 = dma.vmem_to_hbm [thread:$0]  %s533_s7, 256, %s535_s24, [#allocation4], %s817_s29, %s817_s29, %s818_s30  }
 0x358   :  { %814 = dma.done.wait [#allocation4], 256  }
 0x359   :  { %815 = vsyncadd [#allocation4], 4294967040 }
 0x35a   :  { %545 = vsyncpa [#allocation3], 1 }
 0x35b   :  { %546 = vsyncpa [#allocation6], 1 }
 0x35c   :  { %547 = vsyncpa [#allocation9], 1 }
 0x35d   :  { %548 = vsyncpa [#allocation12], 1 }
 0x35e   :  { %549 = vsyncpa [#allocation4], 1 }

</bundles_post_ra>
